<compile_context>
chip_gen: v5e
topology: v5e:2x2
jax: 0.10.0
libtpu: 0.0.40
codegen_flags: <defaults>
</compile_context>

<pallas_src>
import functools

import jax
import jax.numpy as jnp
from jax.experimental import pallas as pl
from jax.experimental.pallas import tpu as pltpu


def _topk_soft_kernel(x_ref, o_ref, *, k, axis):
    """Top-k mask + softmax along `axis` of the 2-D block in x_ref."""
    x = x_ref[...].astype(jnp.float32)
    fill = jnp.float32(-1.0e9)          # same additive-mask fill as the PyTorch module
    neg_inf = jnp.float32(-jnp.inf)     # suppression sentinel (cannot collide with real data)

    # Iterative max-suppression top-k: one cross-lane/sublane (XLU) reduce per
    # iteration. All elements exactly equal to the running max are selected and
    # suppressed together (identical to torch.topk whenever values are distinct).
    work = x
    selected = jnp.zeros(x.shape, dtype=jnp.bool_)
    row_max0 = None
    for i in range(k):
        cur_max = jnp.max(work, axis=axis, keepdims=True)
        if i == 0:
            row_max0 = cur_max          # global row max, reused for softmax stability
        is_max = work == cur_max
        selected = jnp.logical_or(selected, is_max)
        work = jnp.where(is_max, neg_inf, work)

    masked = jnp.where(selected, x, fill)

    # Softmax. max(masked) == max(global row max, fill) -> no extra reduce needed.
    m = jnp.maximum(row_max0, fill)
    e = jnp.exp(masked - m)
    s = jnp.sum(e, axis=axis, keepdims=True)
    inv = pl.reciprocal(s, approx=True)      # EUP slot (off the VPU critical path)
    inv = inv * (2.0 - s * inv)              # one Newton step -> full f32 accuracy
    o_ref[...] = (e * inv).astype(o_ref.dtype)


def _choose_block(num_rows, n, align, cap):
    """Tile extent along the independent-rows axis.

    Budget: ~2 MiB per f32 block buffer; with 2x in + 2x out double buffers plus
    a handful of live temporaries (~10 copies) the working set stays well under
    the 32 MiB scoped-VMEM default on v5e/v6e/v7x.
    """
    per_buf_elems = 512 * 1024
    b = (per_buf_elems // max(n, 1)) // align * align
    b = max(align, min(cap, b))
    if num_rows >= 2 * align:
        # keep at least 2 grid blocks so the row axis can shard across v7x's two TCs
        b = min(b, max(align, ((num_rows + 1) // 2) // align * align))
    if b >= num_rows:
        b = num_rows                     # single full-extent block (always a legal shape)
    return b


def topk_soft(scores, k=3, out_dtype=None):
    """Pallas implementation of TopKSoft.forward(scores) (top-k over the last axis)."""
    assert k >= 1
    orig_shape = scores.shape
    n = orig_shape[-1]
    # bf16 output is allowed if the consumer tolerates it (halves writeback bytes);
    # default keeps the module's dtype behavior (same dtype as the input).
    out_dtype = scores.dtype if out_dtype is None else jnp.dtype(out_dtype)
    x2 = scores.reshape(-1, n)
    m = x2.shape[0]

    lane_dense = n < 128  # small softmax axis -> put it on sublanes, rows on the 128-lane axis

    if lane_dense:
        xk = x2.T                                   # (n, m): rows fill the lane dim
        red_axis = 0
        blk = _choose_block(m, n, align=128, cap=4096)
        block_shape = (n, blk)
        index_map = lambda i: (0, i)
        kernel_out_shape = (n, m)
    else:
        xk = x2                                     # (m, n): n (>=128) on the lane dim
        red_axis = 1
        blk = _choose_block(m, n, align=8, cap=1024)
        block_shape = (blk, n)
        index_map = lambda i: (i, 0)
        kernel_out_shape = (m, n)

    # Ragged last block is fine: rows are fully independent, out-of-bounds input
    # rows only produce garbage in output rows whose writes Pallas discards.
    grid = (pl.cdiv(m, blk),)

    kernel = functools.partial(_topk_soft_kernel, k=k, axis=red_axis)
    bytes_accessed = m * n * (scores.dtype.itemsize + out_dtype.itemsize)
    out = pl.pallas_call(
        kernel,
        out_shape=jax.ShapeDtypeStruct(kernel_out_shape, out_dtype),
        grid_spec=pltpu.PrefetchScalarGridSpec(
            num_scalar_prefetch=0,
            grid=grid,
            in_specs=[pl.BlockSpec(block_shape, index_map)],
            out_specs=pl.BlockSpec(block_shape, index_map),
        ),
        compiler_params=pltpu.CompilerParams(
            dimension_semantics=("parallel",),
            # Above the 32 MiB default (v6e feedback) but below v7x's 64 MiB physical;
            # tiles are budgeted to ~20 MiB so this is headroom, not a requirement.
            vmem_limit_bytes=48 * 1024 * 1024,
        ),
        cost_estimate=pl.CostEstimate(
            flops=2 * m * n * (k + 4),
            transcendentals=m * n,
            bytes_accessed=bytes_accessed,
        ),
    )(xk)

    if lane_dense:
        out = out.T
    return out.reshape(orig_shape)


def _reference(scores, k=3):
    """Pure-JAX mirror of the PyTorch TopKSoft.forward."""
    _, idx = jax.lax.top_k(scores, k)
    one_hot = jnp.sum(jax.nn.one_hot(idx, scores.shape[-1], dtype=scores.dtype), axis=-2)
    mask = jnp.minimum(one_hot, 1.0)
    masked = scores * mask + (-1.0e9) * (1.0 - mask)
    return jax.nn.softmax(masked, axis=-1)


if __name__ == "__main__":
    key = jax.random.PRNGKey(0)
    # scores: (batch=2, seq=8, num_candidates=16); top-k over the last axis, k=3.
    scores = jax.random.normal(key, (2, 8, 16), dtype=jnp.float32)
    out = jax.block_until_ready(topk_soft(scores, k=3))
    ref = _reference(scores, k=3)
    assert out.shape == scores.shape
    assert jnp.allclose(out, ref, atol=1e-5, rtol=1e-5), "mismatch (lane-dense small-N path)"

    # Also exercise the standard layout path (N >= 128 on the lane axis).
    scores2 = jax.random.normal(jax.random.PRNGKey(1), (2, 4, 160), dtype=jnp.float32)
    out2 = jax.block_until_ready(topk_soft(scores2, k=3))
    ref2 = _reference(scores2, k=3)
    assert jnp.allclose(out2, ref2, atol=1e-5, rtol=1e-5), "mismatch (standard N>=128 path)"

    print("KERNEL_OK")
</pallas_src>

<mosaic_0001>
module attributes {stable_mosaic.version = 11 : i64} {
  func.func @_topk_soft_kernel(%arg0: i32, %arg1: memref<16x16xf32, #tpu.memory_space<vmem>>, %arg2: memref<16x16xf32, #tpu.memory_space<vmem>>) attributes {dimension_semantics = [#tpu.dimension_semantics<parallel>], iteration_bounds = array<i64: 1>, scalar_prefetch = 0 : i64, scratch_operands = 0 : i64, tpu.core_type = #tpu.core_type<tc>, window_params = [{transform_indices = @transform_0, window_bounds = array<i64: 16, 16>}, {transform_indices = @transform_1, window_bounds = array<i64: 16, 16>}]} {
    %c0 = arith.constant 0 : index
    %c0_0 = arith.constant 0 : index
    %0 = vector.load %arg1[%c0, %c0_0] : memref<16x16xf32, #tpu.memory_space<vmem>>, vector<16x16xf32>
    %false = arith.constant false
    %1 = vector.broadcast %false : i1 to vector<16x16xi1>
    %cst = arith.constant dense<0xFF800000> : vector<16xf32>
    %2 = vector.multi_reduction <maximumf>, %0, %cst [0] : vector<16x16xf32> to vector<16xf32>
    %3 = vector.shape_cast %2 : vector<16xf32> to vector<1x16xf32>
    %4 = vector.broadcast %3 : vector<1x16xf32> to vector<16x16xf32>
    %5 = arith.cmpf oeq, %0, %4 : vector<16x16xf32>
    %6 = arith.ori %1, %5 : vector<16x16xi1>
    %cst_1 = arith.constant 0xFF800000 : f32
    %7 = vector.broadcast %cst_1 : f32 to vector<16x16xf32>
    %8 = arith.select %5, %7, %0 : vector<16x16xi1>, vector<16x16xf32>
    %cst_2 = arith.constant dense<0xFF800000> : vector<16xf32>
    %9 = vector.multi_reduction <maximumf>, %8, %cst_2 [0] : vector<16x16xf32> to vector<16xf32>
    %10 = vector.shape_cast %9 : vector<16xf32> to vector<1x16xf32>
    %11 = vector.broadcast %10 : vector<1x16xf32> to vector<16x16xf32>
    %12 = arith.cmpf oeq, %8, %11 : vector<16x16xf32>
    %13 = arith.ori %6, %12 : vector<16x16xi1>
    %cst_3 = arith.constant 0xFF800000 : f32
    %14 = vector.broadcast %cst_3 : f32 to vector<16x16xf32>
    %15 = arith.select %12, %14, %8 : vector<16x16xi1>, vector<16x16xf32>
    %cst_4 = arith.constant dense<0xFF800000> : vector<16xf32>
    %16 = vector.multi_reduction <maximumf>, %15, %cst_4 [0] : vector<16x16xf32> to vector<16xf32>
    %17 = vector.shape_cast %16 : vector<16xf32> to vector<1x16xf32>
    %18 = vector.broadcast %17 : vector<1x16xf32> to vector<16x16xf32>
    %19 = arith.cmpf oeq, %15, %18 : vector<16x16xf32>
    %20 = arith.ori %13, %19 : vector<16x16xi1>
    %cst_5 = arith.constant -1.000000e+09 : f32
    %21 = vector.broadcast %cst_5 : f32 to vector<16x16xf32>
    %22 = arith.select %20, %0, %21 : vector<16x16xi1>, vector<16x16xf32>
    %cst_6 = arith.constant -1.000000e+09 : f32
    %23 = vector.broadcast %cst_6 : f32 to vector<1x16xf32>
    %24 = arith.maximumf %3, %23 : vector<1x16xf32>
    %25 = vector.broadcast %24 : vector<1x16xf32> to vector<16x16xf32>
    %26 = arith.subf %22, %25 : vector<16x16xf32>
    %27 = math.exp %26 : vector<16x16xf32>
    %cst_7 = arith.constant dense<0.000000e+00> : vector<16xf32>
    %28 = vector.multi_reduction <add>, %27, %cst_7 [0] : vector<16x16xf32> to vector<16xf32>
    %29 = vector.shape_cast %28 : vector<16xf32> to vector<1x16xf32>
    %30 = tpu.reciprocal %29 {approx = true} : vector<1x16xf32> -> vector<1x16xf32>
    %31 = arith.mulf %29, %30 : vector<1x16xf32>
    %cst_8 = arith.constant 2.000000e+00 : f32
    %32 = vector.broadcast %cst_8 : f32 to vector<1x16xf32>
    %33 = arith.subf %32, %31 : vector<1x16xf32>
    %34 = arith.mulf %30, %33 : vector<1x16xf32>
    %35 = vector.broadcast %34 : vector<1x16xf32> to vector<16x16xf32>
    %36 = arith.mulf %27, %35 : vector<16x16xf32>
    %c0_9 = arith.constant 0 : index
    %c0_10 = arith.constant 0 : index
    %37 = vector.load %arg2[%c0_9, %c0_10] : memref<16x16xf32, #tpu.memory_space<vmem>>, vector<16x16xf32>
    tpu.vector_store %arg2[%c0_9, %c0_10], %36 {strides = array<i32>} : memref<16x16xf32, #tpu.memory_space<vmem>>, vector<16x16xf32>,
    return
  }
  func.func @transform_0(%arg0: i32) -> (i32, i32) {
    %c0_i32 = arith.constant 0 : i32
    %c0_i32_0 = arith.constant 0 : i32
    return %c0_i32, %arg0 : i32, i32
  }
  func.func @transform_1(%arg0: i32) -> (i32, i32) {
    %c0_i32 = arith.constant 0 : i32
    %c0_i32_0 = arith.constant 0 : i32
    return %c0_i32, %arg0 : i32, i32
  }
}

</mosaic_0001>

<bundles_post_ra>
// kernel: tpu_custom_call.1
= control target key start
LH: loop header
LB: loop body
LE: loop exit
PB: predicated region body
PF: predicated region fallthrough
CT: control target
= control target key end

     0   :  { %6 = vsyncpa [#allocation3], 0  ;;  %s216_s0 = inlined_call_operand.hbm [shape: f32[16,16], index: 0, kind: input, shape index: {}]   ;;  %s217_s1 = inlined_call_operand.hbm [shape: f32[16,16], index: 1, kind: output, shape index: {}]  }
   0x1   :  { %7 = vsyncpa [#allocation4], 0  ;;  %s12_s8 = sshll.u32 %s216_s0, 4  ;;  %s176_s9 = smov [#allocation2]   ;;  %s13_s8 = int_to_ptr.hbm [resolvable:$true] %s12_s8 }
   0x2   :  { %s14_s10 = sshll.u32 %s176_s9, 4  ;;  %s177_s11 = smov 128   ;;  %s15_s10 = int_to_ptr.vmem [resolvable:$true] %s14_s10 }
   0x3   :  { %s178_s12 = smov 8  }
   0x4   :  { %20 = dma.hbm_to_vmem [thread:$0]  %s13_s8, 256, %s15_s10, [#allocation3], %s177_s11, %s177_s11, %s178_s12  }
   0x5   :  { %172 = dma.done.wait [#allocation3], 256  }
   0x6   :  { %173 = vsyncadd [#allocation3], 4294967040  ;;  %vm27_vm0 = vcmask 130048   ;;  %v25_v0 = vld [vmem:[#allocation2] sm:$0xff]  ;;  %v26_v1 = vld [vmem:[#allocation2 + $0x8] sm:$0xff]  ;;  %s179_s0 = smov [#allocation5]  }
   0x7   :  { %v28_v2 = vsel %vm27_vm0, %v25_v0, -inf  ;;  %v29_v3 = vsel %vm27_vm0, %v26_v1, -inf  ;;  %s99_s13 = sshll.u32 %s179_s0, 4  ;;  %s101_s16 = sshll.u32 %s217_s1, 4  ;;  %s100_s13 = int_to_ptr.vmem [resolvable:$true] %s99_s13  ;;  %s102_s16 = int_to_ptr.hbm [resolvable:$true] %s101_s16 }
   0x8   :  { %v30_v4 = vmax.f32 %v28_v2, %v29_v3 }
   0xa   :  { %v31_v5 = vrot.slane %v30_v4, 4 }
   0xc   :  { %v32_v6 = vmax.f32 %v30_v4, %v31_v5 }
   0xe   :  { %v33_v7 = vrot.slane %v32_v6, 2 }
  0x10   :  { %v34_v8 = vmax.f32 %v32_v6, %v33_v7 }
  0x12   :  { %v35_v9 = vrot.slane %v34_v8, 1 }
  0x14   :  { %v36_v10 = vmax.f32 %v34_v8, %v35_v9 }
  0x16   :  { %vm37_vm1 = vcmp.eq.f32.partialorder %v25_v0, %v36_v10  ;;  %vm38_vm2 = vcmp.eq.f32.partialorder %v26_v1, %v36_v10  ;;  %v71_v33 = vmax.f32 %v36_v10, -1e+09 }
  0x17   :  { %v39_v11 = vsel %vm37_vm1, -inf, %v25_v0  ;;  %v40_v12 = vsel %vm38_vm2, -inf, %v26_v1 }
  0x18   :  { %v41_v13 = vsel %vm27_vm0, %v39_v11, -inf  ;;  %v42_v14 = vsel %vm27_vm0, %v40_v12, -inf }
  0x19   :  { %v43_v15 = vmax.f32 %v41_v13, %v42_v14 }
  0x1b   :  { %v44_v16 = vrot.slane %v43_v15, 4 }
  0x1d   :  { %v45_v17 = vmax.f32 %v43_v15, %v44_v16 }
  0x1f   :  { %v46_v18 = vrot.slane %v45_v17, 2 }
  0x21   :  { %v47_v19 = vmax.f32 %v45_v17, %v46_v18 }
  0x23   :  { %v48_v20 = vrot.slane %v47_v19, 1 }
  0x25   :  { %v49_v21 = vmax.f32 %v47_v19, %v48_v20 }
  0x27   :  { %vm50_vm3 = vcmp.eq.f32.partialorder %v39_v11, %v49_v21  ;;  %vm51_vm4 = vcmp.eq.f32.partialorder %v40_v12, %v49_v21 }
  0x28   :  { %v54_v22 = vsel %vm50_vm3, -inf, %v39_v11  ;;  %v55_v23 = vsel %vm51_vm4, -inf, %v40_v12  ;;  %vm52_vm5 = vmor %vm37_vm1, %vm50_vm3 }
  0x29   :  { %v56_v24 = vsel %vm27_vm0, %v54_v22, -inf  ;;  %v57_v25 = vsel %vm27_vm0, %v55_v23, -inf  ;;  %vm53_vm6 = vmor %vm38_vm2, %vm51_vm4 }
  0x2a   :  { %v58_v26 = vmax.f32 %v56_v24, %v57_v25 }
  0x2c   :  { %v59_v27 = vrot.slane %v58_v26, 4 }
  0x2e   :  { %v60_v28 = vmax.f32 %v58_v26, %v59_v27 }
  0x30   :  { %v61_v29 = vrot.slane %v60_v28, 2 }
  0x32   :  { %v62_v30 = vmax.f32 %v60_v28, %v61_v29 }
  0x34   :  { %v63_v31 = vrot.slane %v62_v30, 1 }
  0x36   :  { %v64_v32 = vmax.f32 %v62_v30, %v63_v31 }
  0x38   :  { %vm65_vm7 = vcmp.eq.f32.partialorder %v54_v22, %v64_v32  ;;  %vm66_vm8 = vcmp.eq.f32.partialorder %v55_v23, %v64_v32 }
  0x39   :  { %vm67_vm9 = vmor %vm52_vm5, %vm65_vm7 }
  0x3a   :  { %vm68_vm10 = vmor %vm53_vm6, %vm66_vm8  ;;  %v69_v34 = vsel %vm67_vm9, %v25_v0, -1e+09 }
  0x3b   :  { %v70_v35 = vsel %vm68_vm10, %v26_v1, -1e+09  ;;  %v72_v36 = vsub.f32 %v69_v34, %v71_v33 }
  0x3c   :  { %v73_v37 = vsub.f32 %v70_v35, %v71_v33 }
  0x3d   :  { %v74_v38 = vmul.f32 1.442695, %v72_v36 }
  0x3e   :  { %v76_v39 = vmul.f32 1.442695, %v73_v37 }
  0x3f   :  { %118 = vpow2.f32 %v74_v38 }
  0x40   :  { %120 = vpow2.f32 %v76_v39 }
  0x45   :  { %v119_v40 = vpop.eup %118 }
  0x46   :  { %v121_v41 = vpop.eup %120  ;;  %v78_v42 = vsel %vm27_vm0, %v119_v40, 0.0 }
  0x47   :  { %v79_v43 = vsel %vm27_vm0, %v121_v41, 0.0 }
  0x48   :  { %v80_v44 = vadd.f32 %v79_v43, %v78_v42 }
  0x4a   :  { %v81_v45 = vrot.slane %v80_v44, 4 }
  0x4c   :  { %v82_v46 = vadd.f32 %v81_v45, %v80_v44 }
  0x4e   :  { %v83_v47 = vrot.slane %v82_v46, 2 }
  0x50   :  { %v84_v48 = vadd.f32 %v83_v47, %v82_v46 }
  0x52   :  { %v85_v49 = vrot.slane %v84_v48, 1 }
  0x54   :  { %v86_v50 = vadd.f32 %v85_v49, %v84_v48 }
  0x56   :  { %122 = vrcp.f32 %v86_v50 }
  0x5c   :  { %v123_v51 = vpop.eup %122 }
  0x5d   :  { %v88_v52 = vmul.f32 %v123_v51, %v86_v50 }
  0x5f   :  { %v89_v53 = vsub.f32 2.0, %v88_v52 }
  0x61   :  { %v90_v54 = vmul.f32 %v123_v51, %v89_v53 }
  0x63   :  { %v91_v55 = vmul.f32 %v119_v40, %v90_v54  ;;  %v92_v56 = vmul.f32 %v121_v41, %v90_v54 }
  0x65   :  { %93 = vst.msk [vmem:[#allocation5] sm:$0xff] %vm27_vm0, %v91_v55 }
  0x66   :  { %94 = vst.msk [vmem:[#allocation5 + $0x8] sm:$0xff] %vm27_vm0, %v92_v56 }
  0x67   :  { %107 = dma.vmem_to_hbm [thread:$0]  %s100_s13, 256, %s102_s16, [#allocation4], %s177_s11, %s177_s11, %s178_s12  }
  0x68   :  { %174 = dma.done.wait [#allocation4], 256  }
  0x69   :  { %175 = vsyncadd [#allocation4], 4294967040 }
  0x6a   :  { %112 = vsyncpa [#allocation3], 1 }
  0x6b   :  { %113 = vsyncpa [#allocation4], 1 }

</bundles_post_ra>
